<compile_context>
chip_gen: v7x
topology: tpu7x:2x2x1
jax: 0.10.0
libtpu: 0.0.40
codegen_flags: <defaults>
</compile_context>

<pallas_src>
import functools

import numpy as np
import jax
import jax.numpy as jnp
from jax.experimental import pallas as pl
from jax.experimental.pallas import tpu as pltpu

LN_EPS = 1e-5
_INV_SQRT2 = np.float32(1.0 / np.sqrt(2.0))
_NEG_BIG = np.float32(-1e30)


def _layer_norm(x, gamma, beta):
    mu = jnp.mean(x, axis=-1, keepdims=True)
    var = jnp.mean((x - mu) ** 2, axis=-1, keepdims=True)
    return (x - mu) * jax.lax.rsqrt(var + LN_EPS) * gamma + beta


# --------------------------- fused Pallas kernel -----------------------------

def _transformer_layer_kernel(x_ref, g1_ref, b1_ref, wqkv_ref, bqkv_ref,
                              wo_ref, bo_ref, g2_ref, b2_ref,
                              w1_ref, fb1_ref, w2_ref, fb2_ref,
                              o_ref, *, num_heads):
    """Residual(PreNorm(DecayedMHSA)) + Residual(PreNorm(FeedForward)) on a batch block."""
    BB, S, D = x_ref.shape
    H = num_heads
    hd = D // H
    R = BB * S                                      # rows: batch folded into M

    x = x_ref[...].reshape(R, D)                    # (R, D) f32

    # -------- attention block: x1 = x + OutProj(DecayedMHSA(LN1(x)))
    xn = _layer_norm(x, g1_ref[...], b1_ref[...])
    # single lane-dense QKV matmul (MXU N = 3D, not hd); Q scaling pre-folded
    qkv = jnp.dot(xn.astype(jnp.bfloat16), wqkv_ref[...],
                  preferred_element_type=jnp.float32) + bqkv_ref[...]      # (R, 3D)

    def split_heads(t):                             # (R, D) -> (H, R, hd)
        return jnp.stack([t[:, h * hd:(h + 1) * hd] for h in range(H)], axis=0)

    q = split_heads(qkv[:, 0:D]).astype(jnp.bfloat16)
    k = split_heads(qkv[:, D:2 * D]).astype(jnp.bfloat16)
    v = split_heads(qkv[:, 2 * D:3 * D]).astype(jnp.bfloat16)

    s = jnp.einsum('hqd,hkd->hqk', q, k,
                   preferred_element_type=jnp.float32)                     # (H, R, R)

    # decayed re-weighting (folded into logits) + same-batch masking of the
    # folded row axis, all generated in-kernel with iota (no HBM traffic).
    ii = jax.lax.broadcasted_iota(jnp.int32, (R, R), 0).astype(jnp.float32)
    jj = jax.lax.broadcasted_iota(jnp.int32, (R, R), 1).astype(jnp.float32)
    dpos = jnp.maximum(ii - jj, 0.0)                # (i-j) for i>=j within a batch
    bias = -(dpos * dpos)
    if BB > 1:
        inv_s = np.float32(1.0 / S)                 # +0.5 keeps floor() exact at block edges
        bi = jnp.floor((ii + 0.5) * inv_s)
        bj = jnp.floor((jj + 0.5) * inv_s)
        bias = jnp.where(bi == bj, bias, _NEG_BIG)  # mask cross-batch logits
    s = s + bias[None, :, :]

    s = s - jnp.max(s, axis=-1, keepdims=True)
    p = jnp.exp(s)
    p = p * pl.reciprocal(jnp.sum(p, axis=-1, keepdims=True), approx=True)

    attn = jnp.einsum('hqk,hkd->hqd', p.astype(jnp.bfloat16), v,
                      preferred_element_type=jnp.float32)                  # (H, R, hd)
    # merge heads on the lane axis, then ONE (R,D)@(D,D) out-projection matmul
    attn_m = jnp.concatenate([attn[h] for h in range(H)], axis=-1)         # (R, D)
    proj = jnp.dot(attn_m.astype(jnp.bfloat16), wo_ref[...],
                   preferred_element_type=jnp.float32) + bo_ref[...]
    x1 = x + proj                                   # residual add

    # -------- feed-forward block: out = x1 + W2(GELU(W1(LN2(x1))))
    xn2 = _layer_norm(x1, g2_ref[...], b2_ref[...])
    h1 = jnp.dot(xn2.astype(jnp.bfloat16), w1_ref[...],
                 preferred_element_type=jnp.float32) + fb1_ref[...]
    h1 = 0.5 * h1 * (1.0 + jax.lax.erf(h1 * _INV_SQRT2))   # exact (erf) GELU, f32
    y = jnp.dot(h1.astype(jnp.bfloat16), w2_ref[...],
                preferred_element_type=jnp.float32) + fb2_ref[...]

    o_ref[...] = (x1 + y).reshape(BB, S, D)         # residual add


# ------------------------------ wrapper --------------------------------------

def transformer_layer(x, params, *, num_heads, batch_block=None):
    B, S, D = x.shape
    H = num_heads
    assert D % H == 0
    hd = D // H
    L = params["w1"].shape[1]
    bb = B if batch_block is None else batch_block  # benchmark shape: whole batch in one step
    assert B % bb == 0
    n_blocks = B // bb

    # Wrapper-side constant prep: fold hd^-0.5 into Q weights/bias, pre-cast
    # matmul weights to bf16, keep everything lane-dense (full D / 3D / L).
    q_scale = np.float32(hd ** -0.5)
    col_scale = jnp.concatenate(
        [jnp.full((D,), q_scale, jnp.float32),
         jnp.ones((2 * D,), jnp.float32)])[None, :]                 # (1, 3D)
    wqkv = (params["wqkv"] * col_scale).astype(jnp.bfloat16)        # (D, 3D)
    bqkv = (params["bqkv"].reshape(1, 3 * D) * col_scale).astype(jnp.float32)
    wout = params["wout"].astype(jnp.bfloat16)                      # (D, D)
    w1 = params["w1"].astype(jnp.bfloat16)                          # (D, L)
    w2 = params["w2"].astype(jnp.bfloat16)                          # (L, D)

    # Explicit VMEM budget (scoped defaults are only 16/32 MiB); sized from the
    # actual weight + activation + intermediate footprint with 2x headroom,
    # floored at the default and capped below v7x physical VMEM.
    R = bb * S
    est = 4 * (8 * R * D + 3 * R * 3 * D + 4 * H * R * R + 3 * R * L)   # f32 activations
    est += 2 * (3 * D * D + D * D + 2 * D * L) + 4 * (8 * D + L)        # weights/biases
    est += 2 * 2 * 4 * bb * S * D                                       # double-buffered x/out
    vmem_limit = int(min(64 << 20, max(32 << 20, 2 * est)))

    kernel = functools.partial(_transformer_layer_kernel, num_heads=H)
    rep = lambda i: (0, 0)                           # replicated (constant-index) params

    return pl.pallas_call(
        kernel,
        out_shape=jax.ShapeDtypeStruct((B, S, D), jnp.float32),
        grid=(n_blocks,),
        in_specs=[
            pl.BlockSpec((bb, S, D), lambda i: (i, 0, 0)),                # x
            pl.BlockSpec((1, D), rep), pl.BlockSpec((1, D), rep),         # ln1 g, b
            pl.BlockSpec((D, 3 * D), rep), pl.BlockSpec((1, 3 * D), rep),  # wqkv, bqkv
            pl.BlockSpec((D, D), rep), pl.BlockSpec((1, D), rep),         # wout, bout
            pl.BlockSpec((1, D), rep), pl.BlockSpec((1, D), rep),         # ln2 g, b
            pl.BlockSpec((D, L), rep), pl.BlockSpec((1, L), rep),         # w1, b1
            pl.BlockSpec((L, D), rep), pl.BlockSpec((1, D), rep),         # w2, b2
        ],
        out_specs=pl.BlockSpec((bb, S, D), lambda i: (i, 0, 0)),
        compiler_params=pltpu.CompilerParams(
            dimension_semantics=("parallel",),
            vmem_limit_bytes=vmem_limit),
    )(x, params["ln1_g"], params["ln1_b"], wqkv, bqkv,
      wout, params["bout"], params["ln2_g"], params["ln2_b"],
      w1, params["b1"], w2, params["b2"])


# --------------------------- reference & setup --------------------------------

def build_decay_mask(seq_len):
    m = np.zeros((seq_len, seq_len), dtype=np.float32)
    for i in range(1, seq_len):
        np.fill_diagonal(m[i:], float(i ** 2))
    return jnp.asarray(m)


def _reference(x, p, decay, H):
    B, S, D = x.shape
    hd = D // H

    def ln(t, g, b):
        mu = t.mean(-1, keepdims=True)
        var = ((t - mu) ** 2).mean(-1, keepdims=True)
        return (t - mu) / jnp.sqrt(var + LN_EPS) * g + b

    xn = ln(x, p["ln1_g"], p["ln1_b"])
    qkv = xn @ p["wqkv"] + p["bqkv"]
    q, k, v = jnp.split(qkv, 3, axis=-1)
    q = q * (hd ** -0.5)
    heads = lambda t: t.reshape(B, S, H, hd).transpose(0, 2, 1, 3)
    qh, kh, vh = heads(q), heads(k), heads(v)
    w = jnp.einsum("bhqd,bhkd->bhqk", qh, kh)
    w = jax.nn.softmax(w, axis=-1)
    w = w * jnp.exp(-decay)
    w = w / (w.sum(-1, keepdims=True) + 1e-8)
    o = jnp.einsum("bhqk,bhkd->bhqd", w, vh).transpose(0, 2, 1, 3).reshape(B, S, D)
    x1 = x + o @ p["wout"] + p["bout"]
    xn2 = ln(x1, p["ln2_g"], p["ln2_b"])
    hh = xn2 @ p["w1"] + p["b1"]
    hh = 0.5 * hh * (1.0 + jax.lax.erf(hh / np.float32(np.sqrt(2.0))))
    return x1 + hh @ p["w2"] + p["b2"]


if __name__ == "__main__":
    B, S, D, H, L = 2, 8, 32, 4, 64   # batch, seq_len, input_dim, num_heads, latent_dim

    key = jax.random.PRNGKey(0)
    ks = jax.random.split(key, 9)
    sc = np.float32(0.05)
    params = dict(
        ln1_g=jnp.ones((1, D), jnp.float32), ln1_b=jnp.zeros((1, D), jnp.float32),
        wqkv=jax.random.normal(ks[0], (D, 3 * D), jnp.float32) * sc,
        bqkv=jax.random.normal(ks[1], (1, 3 * D), jnp.float32) * sc,
        wout=jax.random.normal(ks[2], (D, D), jnp.float32) * sc,
        bout=jax.random.normal(ks[3], (1, D), jnp.float32) * sc,
        ln2_g=jnp.ones((1, D), jnp.float32), ln2_b=jnp.zeros((1, D), jnp.float32),
        w1=jax.random.normal(ks[4], (D, L), jnp.float32) * sc,
        b1=jax.random.normal(ks[5], (1, L), jnp.float32) * sc,
        w2=jax.random.normal(ks[6], (L, D), jnp.float32) * sc,
        b2=jax.random.normal(ks[7], (1, D), jnp.float32) * sc,
    )
    x = jax.random.normal(ks[8], (B, S, D), jnp.float32)

    out = transformer_layer(x, params, num_heads=H)
    out = jax.block_until_ready(out)

    decay = build_decay_mask(S)          # only used by the pure-JAX reference
    ref = _reference(x, params, decay, H)
    assert out.shape == (B, S, D)
    assert float(jnp.max(jnp.abs(out - ref))) < 1e-2, "mismatch vs pure-JAX reference"
    print("KERNEL_OK")
</pallas_src>

<mosaic_0001>
module attributes {stable_mosaic.version = 11 : i64} {
  func.func @_transformer_layer_kernel(%arg0: i32, %arg1: memref<2x8x32xf32, #tpu.memory_space<vmem>>, %arg2: memref<1x32xf32, #tpu.memory_space<vmem>>, %arg3: memref<1x32xf32, #tpu.memory_space<vmem>>, %arg4: memref<32x96xbf16, #tpu.memory_space<vmem>>, %arg5: memref<1x96xf32, #tpu.memory_space<vmem>>, %arg6: memref<32x32xbf16, #tpu.memory_space<vmem>>, %arg7: memref<1x32xf32, #tpu.memory_space<vmem>>, %arg8: memref<1x32xf32, #tpu.memory_space<vmem>>, %arg9: memref<1x32xf32, #tpu.memory_space<vmem>>, %arg10: memref<32x64xbf16, #tpu.memory_space<vmem>>, %arg11: memref<1x64xf32, #tpu.memory_space<vmem>>, %arg12: memref<64x32xbf16, #tpu.memory_space<vmem>>, %arg13: memref<1x32xf32, #tpu.memory_space<vmem>>, %arg14: memref<2x8x32xf32, #tpu.memory_space<vmem>>) attributes {dimension_semantics = [#tpu.dimension_semantics<parallel>], iteration_bounds = array<i64: 1>, scalar_prefetch = 0 : i64, scratch_operands = 0 : i64, tpu.core_type = #tpu.core_type<tc>, window_params = [{transform_indices = @transform_0, window_bounds = array<i64: 2, 8, 32>}, {pipeline_mode = #tpu.pipeline_mode<synchronous>, transform_indices = @transform_1, window_bounds = array<i64: 1, 32>}, {pipeline_mode = #tpu.pipeline_mode<synchronous>, transform_indices = @transform_2, window_bounds = array<i64: 1, 32>}, {pipeline_mode = #tpu.pipeline_mode<synchronous>, transform_indices = @transform_3, window_bounds = array<i64: 32, 96>}, {pipeline_mode = #tpu.pipeline_mode<synchronous>, transform_indices = @transform_4, window_bounds = array<i64: 1, 96>}, {pipeline_mode = #tpu.pipeline_mode<synchronous>, transform_indices = @transform_5, window_bounds = array<i64: 32, 32>}, {pipeline_mode = #tpu.pipeline_mode<synchronous>, transform_indices = @transform_6, window_bounds = array<i64: 1, 32>}, {pipeline_mode = #tpu.pipeline_mode<synchronous>, transform_indices = @transform_7, window_bounds = array<i64: 1, 32>}, {pipeline_mode = #tpu.pipeline_mode<synchronous>, transform_indices = @transform_8, window_bounds = array<i64: 1, 32>}, {pipeline_mode = #tpu.pipeline_mode<synchronous>, transform_indices = @transform_9, window_bounds = array<i64: 32, 64>}, {pipeline_mode = #tpu.pipeline_mode<synchronous>, transform_indices = @transform_10, window_bounds = array<i64: 1, 64>}, {pipeline_mode = #tpu.pipeline_mode<synchronous>, transform_indices = @transform_11, window_bounds = array<i64: 64, 32>}, {pipeline_mode = #tpu.pipeline_mode<synchronous>, transform_indices = @transform_12, window_bounds = array<i64: 1, 32>}, {transform_indices = @transform_13, window_bounds = array<i64: 2, 8, 32>}]} {
    %c0 = arith.constant 0 : index
    %c0_0 = arith.constant 0 : index
    %c0_1 = arith.constant 0 : index
    %0 = vector.load %arg1[%c0, %c0_0, %c0_1] : memref<2x8x32xf32, #tpu.memory_space<vmem>>, vector<2x8x32xf32>
    %1 = vector.shape_cast %0 : vector<2x8x32xf32> to vector<16x32xf32>
    %c0_2 = arith.constant 0 : index
    %c0_3 = arith.constant 0 : index
    %2 = vector.load %arg2[%c0_2, %c0_3] : memref<1x32xf32, #tpu.memory_space<vmem>>, vector<1x32xf32>
    %c0_4 = arith.constant 0 : index
    %c0_5 = arith.constant 0 : index
    %3 = vector.load %arg3[%c0_4, %c0_5] : memref<1x32xf32, #tpu.memory_space<vmem>>, vector<1x32xf32>
    %cst = arith.constant dense<0.000000e+00> : vector<16xf32>
    %4 = vector.multi_reduction <add>, %1, %cst [1] : vector<16x32xf32> to vector<16xf32>
    %5 = vector.shape_cast %4 : vector<16xf32> to vector<16x1xf32>
    %cst_6 = arith.constant 3.200000e+01 : f32
    %6 = vector.broadcast %cst_6 : f32 to vector<16x1xf32>
    %7 = arith.divf %5, %6 : vector<16x1xf32>
    %8 = vector.broadcast %7 : vector<16x1xf32> to vector<16x32xf32>
    %9 = arith.subf %1, %8 : vector<16x32xf32>
    %10 = arith.mulf %9, %9 : vector<16x32xf32>
    %cst_7 = arith.constant dense<0.000000e+00> : vector<16xf32>
    %11 = vector.multi_reduction <add>, %10, %cst_7 [1] : vector<16x32xf32> to vector<16xf32>
    %12 = vector.shape_cast %11 : vector<16xf32> to vector<16x1xf32>
    %cst_8 = arith.constant 3.200000e+01 : f32
    %13 = vector.broadcast %cst_8 : f32 to vector<16x1xf32>
    %14 = arith.divf %12, %13 : vector<16x1xf32>
    %15 = vector.broadcast %7 : vector<16x1xf32> to vector<16x32xf32>
    %16 = arith.subf %1, %15 : vector<16x32xf32>
    %cst_9 = arith.constant 9.99999974E-6 : f32
    %17 = vector.broadcast %cst_9 : f32 to vector<16x1xf32>
    %18 = arith.addf %14, %17 : vector<16x1xf32>
    %19 = math.rsqrt %18 : vector<16x1xf32>
    %20 = vector.broadcast %19 : vector<16x1xf32> to vector<16x32xf32>
    %21 = arith.mulf %16, %20 : vector<16x32xf32>
    %22 = vector.broadcast %2 : vector<1x32xf32> to vector<16x32xf32>
    %23 = arith.mulf %21, %22 : vector<16x32xf32>
    %24 = vector.broadcast %3 : vector<1x32xf32> to vector<16x32xf32>
    %25 = arith.addf %23, %24 : vector<16x32xf32>
    %26 = arith.truncf %25 : vector<16x32xf32> to vector<16x32xbf16>
    %c0_10 = arith.constant 0 : index
    %c0_11 = arith.constant 0 : index
    %27 = vector.load %arg4[%c0_10, %c0_11] : memref<32x96xbf16, #tpu.memory_space<vmem>>, vector<32x96xbf16>
    %cst_12 = arith.constant dense<0.000000e+00> : vector<16x96xf32>
    %28 = tpu.matmul %26, %27, %cst_12 {dimension_numbers = #tpu.dot_dimension_numbers<[1], [0], [0], [1], [0, 0, 1, 1], [], []>} : vector<16x32xbf16>, vector<32x96xbf16>, vector<16x96xf32> -> vector<16x96xf32>
    %c0_13 = arith.constant 0 : index
    %c0_14 = arith.constant 0 : index
    %29 = vector.load %arg5[%c0_13, %c0_14] : memref<1x96xf32, #tpu.memory_space<vmem>>, vector<1x96xf32>
    %30 = vector.broadcast %29 : vector<1x96xf32> to vector<16x96xf32>
    %31 = arith.addf %28, %30 : vector<16x96xf32>
    %32 = vector.extract_strided_slice %31 {offsets = [0, 0], sizes = [16, 32], strides = [1, 1]} : vector<16x96xf32> to vector<16x32xf32>
    %33 = vector.extract_strided_slice %32 {offsets = [0, 0], sizes = [16, 8], strides = [1, 1]} : vector<16x32xf32> to vector<16x8xf32>
    %34 = vector.extract_strided_slice %32 {offsets = [0, 8], sizes = [16, 8], strides = [1, 1]} : vector<16x32xf32> to vector<16x8xf32>
    %35 = vector.extract_strided_slice %32 {offsets = [0, 16], sizes = [16, 8], strides = [1, 1]} : vector<16x32xf32> to vector<16x8xf32>
    %36 = vector.extract_strided_slice %32 {offsets = [0, 24], sizes = [16, 8], strides = [1, 1]} : vector<16x32xf32> to vector<16x8xf32>
    %37 = vector.shape_cast %33 : vector<16x8xf32> to vector<1x16x8xf32>
    %38 = vector.shape_cast %34 : vector<16x8xf32> to vector<1x16x8xf32>
    %39 = vector.shape_cast %35 : vector<16x8xf32> to vector<1x16x8xf32>
    %40 = vector.shape_cast %36 : vector<16x8xf32> to vector<1x16x8xf32>
    %41 = tpu.concatenate %37, %38, %39, %40 in 0 : vector<1x16x8xf32>, vector<1x16x8xf32>, vector<1x16x8xf32>, vector<1x16x8xf32> -> vector<4x16x8xf32>
    %42 = arith.truncf %41 : vector<4x16x8xf32> to vector<4x16x8xbf16>
    %43 = vector.extract_strided_slice %31 {offsets = [0, 32], sizes = [16, 32], strides = [1, 1]} : vector<16x96xf32> to vector<16x32xf32>
    %44 = vector.extract_strided_slice %43 {offsets = [0, 0], sizes = [16, 8], strides = [1, 1]} : vector<16x32xf32> to vector<16x8xf32>
    %45 = vector.extract_strided_slice %43 {offsets = [0, 8], sizes = [16, 8], strides = [1, 1]} : vector<16x32xf32> to vector<16x8xf32>
    %46 = vector.extract_strided_slice %43 {offsets = [0, 16], sizes = [16, 8], strides = [1, 1]} : vector<16x32xf32> to vector<16x8xf32>
    %47 = vector.extract_strided_slice %43 {offsets = [0, 24], sizes = [16, 8], strides = [1, 1]} : vector<16x32xf32> to vector<16x8xf32>
    %48 = vector.shape_cast %44 : vector<16x8xf32> to vector<1x16x8xf32>
    %49 = vector.shape_cast %45 : vector<16x8xf32> to vector<1x16x8xf32>
    %50 = vector.shape_cast %46 : vector<16x8xf32> to vector<1x16x8xf32>
    %51 = vector.shape_cast %47 : vector<16x8xf32> to vector<1x16x8xf32>
    %52 = tpu.concatenate %48, %49, %50, %51 in 0 : vector<1x16x8xf32>, vector<1x16x8xf32>, vector<1x16x8xf32>, vector<1x16x8xf32> -> vector<4x16x8xf32>
    %53 = arith.truncf %52 : vector<4x16x8xf32> to vector<4x16x8xbf16>
    %54 = vector.extract_strided_slice %31 {offsets = [0, 64], sizes = [16, 32], strides = [1, 1]} : vector<16x96xf32> to vector<16x32xf32>
    %55 = vector.extract_strided_slice %54 {offsets = [0, 0], sizes = [16, 8], strides = [1, 1]} : vector<16x32xf32> to vector<16x8xf32>
    %56 = vector.extract_strided_slice %54 {offsets = [0, 8], sizes = [16, 8], strides = [1, 1]} : vector<16x32xf32> to vector<16x8xf32>
    %57 = vector.extract_strided_slice %54 {offsets = [0, 16], sizes = [16, 8], strides = [1, 1]} : vector<16x32xf32> to vector<16x8xf32>
    %58 = vector.extract_strided_slice %54 {offsets = [0, 24], sizes = [16, 8], strides = [1, 1]} : vector<16x32xf32> to vector<16x8xf32>
    %59 = vector.shape_cast %55 : vector<16x8xf32> to vector<1x16x8xf32>
    %60 = vector.shape_cast %56 : vector<16x8xf32> to vector<1x16x8xf32>
    %61 = vector.shape_cast %57 : vector<16x8xf32> to vector<1x16x8xf32>
    %62 = vector.shape_cast %58 : vector<16x8xf32> to vector<1x16x8xf32>
    %63 = tpu.concatenate %59, %60, %61, %62 in 0 : vector<1x16x8xf32>, vector<1x16x8xf32>, vector<1x16x8xf32>, vector<1x16x8xf32> -> vector<4x16x8xf32>
    %64 = arith.truncf %63 : vector<4x16x8xf32> to vector<4x16x8xbf16>
    "tpu.trace_start"() <{level = 10 : i32, message = "hqd,hkd->hqk"}> : () -> ()
    %cst_15 = arith.constant dense<0.000000e+00> : vector<4x16x16xf32>
    %65 = tpu.matmul %42, %53, %cst_15 {dimension_numbers = #tpu.dot_dimension_numbers<[2], [2], [1], [1], [0, 0, 0, 1, 1, 1], [0], [0]>} : vector<4x16x8xbf16>, vector<4x16x8xbf16>, vector<4x16x16xf32> -> vector<4x16x16xf32>
    "tpu.trace_stop"() : () -> ()
    %66 = tpu.iota {dimensions = array<i32: 0>} : vector<16x16xi32>
    %67 = arith.sitofp %66 : vector<16x16xi32> to vector<16x16xf32>
    %68 = tpu.iota {dimensions = array<i32: 1>} : vector<16x16xi32>
    %69 = arith.sitofp %68 : vector<16x16xi32> to vector<16x16xf32>
    %70 = arith.subf %67, %69 : vector<16x16xf32>
    %cst_16 = arith.constant 0.000000e+00 : f32
    %71 = vector.broadcast %cst_16 : f32 to vector<16x16xf32>
    %72 = arith.maximumf %70, %71 : vector<16x16xf32>
    %73 = arith.mulf %72, %72 : vector<16x16xf32>
    %cst_17 = arith.constant 0.000000e+00 : f32
    %74 = vector.broadcast %cst_17 : f32 to vector<16x16xf32>
    %75 = arith.subf %74, %73 : vector<16x16xf32>
    %cst_18 = arith.constant 5.000000e-01 : f32
    %76 = vector.broadcast %cst_18 : f32 to vector<16x16xf32>
    %77 = arith.addf %67, %76 : vector<16x16xf32>
    %cst_19 = arith.constant 1.250000e-01 : f32
    %78 = vector.broadcast %cst_19 : f32 to vector<16x16xf32>
    %79 = arith.mulf %77, %78 : vector<16x16xf32>
    %80 = math.floor %79 : vector<16x16xf32>
    %cst_20 = arith.constant 5.000000e-01 : f32
    %81 = vector.broadcast %cst_20 : f32 to vector<16x16xf32>
    %82 = arith.addf %69, %81 : vector<16x16xf32>
    %cst_21 = arith.constant 1.250000e-01 : f32
    %83 = vector.broadcast %cst_21 : f32 to vector<16x16xf32>
    %84 = arith.mulf %82, %83 : vector<16x16xf32>
    %85 = math.floor %84 : vector<16x16xf32>
    %86 = arith.cmpf oeq, %80, %85 : vector<16x16xf32>
    %cst_22 = arith.constant -1.000000e+30 : f32
    %87 = vector.broadcast %cst_22 : f32 to vector<16x16xf32>
    %88 = arith.select %86, %75, %87 : vector<16x16xi1>, vector<16x16xf32>
    %89 = vector.shape_cast %88 : vector<16x16xf32> to vector<1x16x16xf32>
    %90 = vector.broadcast %89 : vector<1x16x16xf32> to vector<4x16x16xf32>
    %91 = arith.addf %65, %90 : vector<4x16x16xf32>
    %cst_23 = arith.constant dense<0xFF800000> : vector<4x16xf32>
    %92 = vector.multi_reduction <maximumf>, %91, %cst_23 [2] : vector<4x16x16xf32> to vector<4x16xf32>
    %93 = vector.shape_cast %92 : vector<4x16xf32> to vector<4x16x1xf32>
    %94 = vector.broadcast %93 : vector<4x16x1xf32> to vector<4x16x16xf32>
    %95 = arith.subf %91, %94 : vector<4x16x16xf32>
    %96 = math.exp %95 : vector<4x16x16xf32>
    %cst_24 = arith.constant dense<0.000000e+00> : vector<4x16xf32>
    %97 = vector.multi_reduction <add>, %96, %cst_24 [2] : vector<4x16x16xf32> to vector<4x16xf32>
    %98 = vector.shape_cast %97 : vector<4x16xf32> to vector<4x16x1xf32>
    %99 = tpu.reciprocal %98 {approx = true} : vector<4x16x1xf32> -> vector<4x16x1xf32>
    %100 = vector.broadcast %99 : vector<4x16x1xf32> to vector<4x16x16xf32>
    %101 = arith.mulf %96, %100 : vector<4x16x16xf32>
    %102 = arith.truncf %101 : vector<4x16x16xf32> to vector<4x16x16xbf16>
    "tpu.trace_start"() <{level = 10 : i32, message = "hqk,hkd->hqd"}> : () -> ()
    %cst_25 = arith.constant dense<0.000000e+00> : vector<4x16x8xf32>
    %103 = tpu.matmul %102, %64, %cst_25 {dimension_numbers = #tpu.dot_dimension_numbers<[2], [1], [1], [2], [0, 0, 0, 1, 1, 2], [0], [0]>} : vector<4x16x16xbf16>, vector<4x16x8xbf16>, vector<4x16x8xf32> -> vector<4x16x8xf32>
    "tpu.trace_stop"() : () -> ()
    %104 = vector.extract_strided_slice %103 {offsets = [0, 0, 0], sizes = [1, 16, 8], strides = [1, 1, 1]} : vector<4x16x8xf32> to vector<1x16x8xf32>
    %105 = vector.shape_cast %104 : vector<1x16x8xf32> to vector<16x8xf32>
    %106 = vector.extract_strided_slice %103 {offsets = [1, 0, 0], sizes = [1, 16, 8], strides = [1, 1, 1]} : vector<4x16x8xf32> to vector<1x16x8xf32>
    %107 = vector.shape_cast %106 : vector<1x16x8xf32> to vector<16x8xf32>
    %108 = vector.extract_strided_slice %103 {offsets = [2, 0, 0], sizes = [1, 16, 8], strides = [1, 1, 1]} : vector<4x16x8xf32> to vector<1x16x8xf32>
    %109 = vector.shape_cast %108 : vector<1x16x8xf32> to vector<16x8xf32>
    %110 = vector.extract_strided_slice %103 {offsets = [3, 0, 0], sizes = [1, 16, 8], strides = [1, 1, 1]} : vector<4x16x8xf32> to vector<1x16x8xf32>
    %111 = vector.shape_cast %110 : vector<1x16x8xf32> to vector<16x8xf32>
    %112 = tpu.concatenate %105, %107, %109, %111 in 1 : vector<16x8xf32>, vector<16x8xf32>, vector<16x8xf32>, vector<16x8xf32> -> vector<16x32xf32>
    %113 = arith.truncf %112 : vector<16x32xf32> to vector<16x32xbf16>
    %c0_26 = arith.constant 0 : index
    %c0_27 = arith.constant 0 : index
    %114 = vector.load %arg6[%c0_26, %c0_27] : memref<32x32xbf16, #tpu.memory_space<vmem>>, vector<32x32xbf16>
    %cst_28 = arith.constant dense<0.000000e+00> : vector<16x32xf32>
    %115 = tpu.matmul %113, %114, %cst_28 {dimension_numbers = #tpu.dot_dimension_numbers<[1], [0], [0], [1], [0, 0, 1, 1], [], []>} : vector<16x32xbf16>, vector<32x32xbf16>, vector<16x32xf32> -> vector<16x32xf32>
    %c0_29 = arith.constant 0 : index
    %c0_30 = arith.constant 0 : index
    %116 = vector.load %arg7[%c0_29, %c0_30] : memref<1x32xf32, #tpu.memory_space<vmem>>, vector<1x32xf32>
    %117 = vector.broadcast %116 : vector<1x32xf32> to vector<16x32xf32>
    %118 = arith.addf %115, %117 : vector<16x32xf32>
    %119 = arith.addf %1, %118 : vector<16x32xf32>
    %c0_31 = arith.constant 0 : index
    %c0_32 = arith.constant 0 : index
    %120 = vector.load %arg8[%c0_31, %c0_32] : memref<1x32xf32, #tpu.memory_space<vmem>>, vector<1x32xf32>
    %c0_33 = arith.constant 0 : index
    %c0_34 = arith.constant 0 : index
    %121 = vector.load %arg9[%c0_33, %c0_34] : memref<1x32xf32, #tpu.memory_space<vmem>>, vector<1x32xf32>
    %cst_35 = arith.constant dense<0.000000e+00> : vector<16xf32>
    %122 = vector.multi_reduction <add>, %119, %cst_35 [1] : vector<16x32xf32> to vector<16xf32>
    %123 = vector.shape_cast %122 : vector<16xf32> to vector<16x1xf32>
    %cst_36 = arith.constant 3.200000e+01 : f32
    %124 = vector.broadcast %cst_36 : f32 to vector<16x1xf32>
    %125 = arith.divf %123, %124 : vector<16x1xf32>
    %126 = vector.broadcast %125 : vector<16x1xf32> to vector<16x32xf32>
    %127 = arith.subf %119, %126 : vector<16x32xf32>
    %128 = arith.mulf %127, %127 : vector<16x32xf32>
    %cst_37 = arith.constant dense<0.000000e+00> : vector<16xf32>
    %129 = vector.multi_reduction <add>, %128, %cst_37 [1] : vector<16x32xf32> to vector<16xf32>
    %130 = vector.shape_cast %129 : vector<16xf32> to vector<16x1xf32>
    %cst_38 = arith.constant 3.200000e+01 : f32
    %131 = vector.broadcast %cst_38 : f32 to vector<16x1xf32>
    %132 = arith.divf %130, %131 : vector<16x1xf32>
    %133 = vector.broadcast %125 : vector<16x1xf32> to vector<16x32xf32>
    %134 = arith.subf %119, %133 : vector<16x32xf32>
    %cst_39 = arith.constant 9.99999974E-6 : f32
    %135 = vector.broadcast %cst_39 : f32 to vector<16x1xf32>
    %136 = arith.addf %132, %135 : vector<16x1xf32>
    %137 = math.rsqrt %136 : vector<16x1xf32>
    %138 = vector.broadcast %137 : vector<16x1xf32> to vector<16x32xf32>
    %139 = arith.mulf %134, %138 : vector<16x32xf32>
    %140 = vector.broadcast %120 : vector<1x32xf32> to vector<16x32xf32>
    %141 = arith.mulf %139, %140 : vector<16x32xf32>
    %142 = vector.broadcast %121 : vector<1x32xf32> to vector<16x32xf32>
    %143 = arith.addf %141, %142 : vector<16x32xf32>
    %144 = arith.truncf %143 : vector<16x32xf32> to vector<16x32xbf16>
    %c0_40 = arith.constant 0 : index
    %c0_41 = arith.constant 0 : index
    %145 = vector.load %arg10[%c0_40, %c0_41] : memref<32x64xbf16, #tpu.memory_space<vmem>>, vector<32x64xbf16>
    %cst_42 = arith.constant dense<0.000000e+00> : vector<16x64xf32>
    %146 = tpu.matmul %144, %145, %cst_42 {dimension_numbers = #tpu.dot_dimension_numbers<[1], [0], [0], [1], [0, 0, 1, 1], [], []>} : vector<16x32xbf16>, vector<32x64xbf16>, vector<16x64xf32> -> vector<16x64xf32>
    %c0_43 = arith.constant 0 : index
    %c0_44 = arith.constant 0 : index
    %147 = vector.load %arg11[%c0_43, %c0_44] : memref<1x64xf32, #tpu.memory_space<vmem>>, vector<1x64xf32>
    %148 = vector.broadcast %147 : vector<1x64xf32> to vector<16x64xf32>
    %149 = arith.addf %146, %148 : vector<16x64xf32>
    %cst_45 = arith.constant 5.000000e-01 : f32
    %150 = vector.broadcast %cst_45 : f32 to vector<16x64xf32>
    %151 = arith.mulf %150, %149 : vector<16x64xf32>
    %cst_46 = arith.constant 0.707106769 : f32
    %152 = vector.broadcast %cst_46 : f32 to vector<16x64xf32>
    %153 = arith.mulf %149, %152 : vector<16x64xf32>
    %154 = math.erf %153 : vector<16x64xf32>
    %cst_47 = arith.constant 1.000000e+00 : f32
    %155 = vector.broadcast %cst_47 : f32 to vector<16x64xf32>
    %156 = arith.addf %155, %154 : vector<16x64xf32>
    %157 = arith.mulf %151, %156 : vector<16x64xf32>
    %158 = arith.truncf %157 : vector<16x64xf32> to vector<16x64xbf16>
    %c0_48 = arith.constant 0 : index
    %c0_49 = arith.constant 0 : index
    %159 = vector.load %arg12[%c0_48, %c0_49] : memref<64x32xbf16, #tpu.memory_space<vmem>>, vector<64x32xbf16>
    %cst_50 = arith.constant dense<0.000000e+00> : vector<16x32xf32>
    %160 = tpu.matmul %158, %159, %cst_50 {dimension_numbers = #tpu.dot_dimension_numbers<[1], [0], [0], [1], [0, 0, 1, 1], [], []>} : vector<16x64xbf16>, vector<64x32xbf16>, vector<16x32xf32> -> vector<16x32xf32>
    %c0_51 = arith.constant 0 : index
    %c0_52 = arith.constant 0 : index
    %161 = vector.load %arg13[%c0_51, %c0_52] : memref<1x32xf32, #tpu.memory_space<vmem>>, vector<1x32xf32>
    %162 = vector.broadcast %161 : vector<1x32xf32> to vector<16x32xf32>
    %163 = arith.addf %160, %162 : vector<16x32xf32>
    %164 = arith.addf %119, %163 : vector<16x32xf32>
    %165 = vector.shape_cast %164 : vector<16x32xf32> to vector<2x8x32xf32>
    %c0_53 = arith.constant 0 : index
    %c0_54 = arith.constant 0 : index
    %c0_55 = arith.constant 0 : index
    %166 = vector.load %arg14[%c0_53, %c0_54, %c0_55] : memref<2x8x32xf32, #tpu.memory_space<vmem>>, vector<2x8x32xf32>
    tpu.vector_store %arg14[%c0_53, %c0_54, %c0_55], %165 {strides = array<i32>} : memref<2x8x32xf32, #tpu.memory_space<vmem>>, vector<2x8x32xf32>,
    return
  }
  func.func @transform_0(%arg0: i32) -> (i32, i32, i32) {
    %c0_i32 = arith.constant 0 : i32
    %c0_i32_0 = arith.constant 0 : i32
    %c0_i32_1 = arith.constant 0 : i32
    return %arg0, %c0_i32, %c0_i32_0 : i32, i32, i32
  }
  func.func @transform_1(%arg0: i32) -> (i32, i32) {
    %c0_i32 = arith.constant 0 : i32
    %c0_i32_0 = arith.constant 0 : i32
    %c0_i32_1 = arith.constant 0 : i32
    return %c0_i32, %c0_i32_0 : i32, i32
  }
  func.func @transform_2(%arg0: i32) -> (i32, i32) {
    %c0_i32 = arith.constant 0 : i32
    %c0_i32_0 = arith.constant 0 : i32
    %c0_i32_1 = arith.constant 0 : i32
    return %c0_i32, %c0_i32_0 : i32, i32
  }
  func.func @transform_3(%arg0: i32) -> (i32, i32) {
    %c0_i32 = arith.constant 0 : i32
    %c0_i32_0 = arith.constant 0 : i32
    %c0_i32_1 = arith.constant 0 : i32
    return %c0_i32, %c0_i32_0 : i32, i32
  }
  func.func @transform_4(%arg0: i32) -> (i32, i32) {
    %c0_i32 = arith.constant 0 : i32
    %c0_i32_0 = arith.constant 0 : i32
    %c0_i32_1 = arith.constant 0 : i32
    return %c0_i32, %c0_i32_0 : i32, i32
  }
  func.func @transform_5(%arg0: i32) -> (i32, i32) {
    %c0_i32 = arith.constant 0 : i32
    %c0_i32_0 = arith.constant 0 : i32
    %c0_i32_1 = arith.constant 0 : i32
    return %c0_i32, %c0_i32_0 : i32, i32
  }
  func.func @transform_6(%arg0: i32) -> (i32, i32) {
    %c0_i32 = arith.constant 0 : i32
    %c0_i32_0 = arith.constant 0 : i32
    %c0_i32_1 = arith.constant 0 : i32
    return %c0_i32, %c0_i32_0 : i32, i32
  }
  func.func @transform_7(%arg0: i32) -> (i32, i32) {
    %c0_i32 = arith.constant 0 : i32
    %c0_i32_0 = arith.constant 0 : i32
    %c0_i32_1 = arith.constant 0 : i32
    return %c0_i32, %c0_i32_0 : i32, i32
  }
  func.func @transform_8(%arg0: i32) -> (i32, i32) {
    %c0_i32 = arith.constant 0 : i32
    %c0_i32_0 = arith.constant 0 : i32
    %c0_i32_1 = arith.constant 0 : i32
    return %c0_i32, %c0_i32_0 : i32, i32
  }
  func.func @transform_9(%arg0: i32) -> (i32, i32) {
    %c0_i32 = arith.constant 0 : i32
    %c0_i32_0 = arith.constant 0 : i32
    %c0_i32_1 = arith.constant 0 : i32
    return %c0_i32, %c0_i32_0 : i32, i32
  }
  func.func @transform_10(%arg0: i32) -> (i32, i32) {
    %c0_i32 = arith.constant 0 : i32
    %c0_i32_0 = arith.constant 0 : i32
    %c0_i32_1 = arith.constant 0 : i32
    return %c0_i32, %c0_i32_0 : i32, i32
  }
  func.func @transform_11(%arg0: i32) -> (i32, i32) {
    %c0_i32 = arith.constant 0 : i32
    %c0_i32_0 = arith.constant 0 : i32
    %c0_i32_1 = arith.constant 0 : i32
    return %c0_i32, %c0_i32_0 : i32, i32
  }
  func.func @transform_12(%arg0: i32) -> (i32, i32) {
    %c0_i32 = arith.constant 0 : i32
    %c0_i32_0 = arith.constant 0 : i32
    %c0_i32_1 = arith.constant 0 : i32
    return %c0_i32, %c0_i32_0 : i32, i32
  }
  func.func @transform_13(%arg0: i32) -> (i32, i32, i32) {
    %c0_i32 = arith.constant 0 : i32
    %c0_i32_0 = arith.constant 0 : i32
    %c0_i32_1 = arith.constant 0 : i32
    return %arg0, %c0_i32, %c0_i32_0 : i32, i32, i32
  }
}

</mosaic_0001>

<bundles_post_ra>
// kernel: tpu_custom_call.1
= control target key start
LH: loop header
LB: loop body
LE: loop exit
PB: predicated region body
PF: predicated region fallthrough
CT: control target
= control target key end

     0   :  { %18 = vsyncpa [#allocation3], 0  ;;  %s1764_s0 = inlined_call_operand.vmem [shape: f32[2,8,32], index: 0, kind: input, shape index: {}]   ;;  %s1765_s1 = inlined_call_operand.vmem [shape: f32[1,32], index: 1, kind: input, shape index: {}]   ;;  %s1766_s2 = inlined_call_operand.vmem [shape: f32[1,32], index: 2, kind: input, shape index: {}]   ;;  %s1767_s3 = inlined_call_operand.vmem [shape: bf16[32,96], index: 3, kind: input, shape index: {}]   ;;  %s1768_s4 = inlined_call_operand.hbm [shape: f32[1,96], index: 4, kind: input, shape index: {}]   ;;  %s1769_s5 = inlined_call_operand.vmem [shape: bf16[32,32], index: 5, kind: input, shape index: {}]   ;;  %s1770_s6 = inlined_call_operand.hbm [shape: f32[1,32], index: 6, kind: input, shape index: {}]   ;;  %s1771_s7 = inlined_call_operand.hbm [shape: f32[1,32], index: 7, kind: input, shape index: {}]   ;;  %s1772_s8 = inlined_call_operand.hbm [shape: f32[1,32], index: 8, kind: input, shape index: {}]   ;;  %s1773_s9 = inlined_call_operand.vmem [shape: bf16[32,64], index: 9, kind: input, shape index: {}]   ;;  %s1774_s10 = inlined_call_operand.vmem [shape: f32[1,64], index: 10, kind: input, shape index: {}]   ;;  %s1775_s11 = inlined_call_operand.vmem [shape: bf16[64,32], index: 11, kind: input, shape index: {}]   ;;  %s1776_s12 = inlined_call_operand.vmem [shape: f32[1,32], index: 12, kind: input, shape index: {}]   ;;  %s1777_s13 = inlined_call_operand.hbm [shape: f32[2,8,32], index: 13, kind: output, shape index: {}]  }
   0x1   :  { %19 = vsyncpa [#allocation6], 0 }
   0x2   :  { %20 = vsyncpa [#allocation9], 0 }
   0x3   :  { %21 = vsyncpa [#allocation4], 0  ;;  %s1437_s25 = smov [#allocation5]   ;;  %s1438_s27 = smov [#allocation2]  }
   0x4   :  { %s48_s26 = sshll.u32 %s1437_s25, 4  ;;  %s36_s28 = sshll.u32 %s1438_s27, 4  ;;  %s49_s26 = int_to_ptr.vmem [resolvable:$true] %s48_s26  ;;  %s37_s28 = int_to_ptr.vmem [resolvable:$true] %s36_s28 }
   0x5   :  { %s1319_s14 = scalar_lea.hbm %s1770_s6, 16 }
   0x6   :  { %p1320_p0 = scmp.ne.s32.totalorder %s1770_s6, %s1319_s14  ;;  %p1323_p1 = scmp.lt.u32.totalorder %s1319_s14, %s1770_s6 }
   0x8   :  { %p1325_p2 = pnand %p1323_p1, %p1320_p0 }
   0xa   :  { %1328 = shalt.err (!%p1325_p2)
}
   0xb   :  { %s1329_s19 = scalar_lea.vmem %s49_s26, 16  ;;  %s1333_s20 = scalar_lea.vmem %s49_s26, 32 }
   0xc   :  { %p1330_p3 = scmp.ne.s32.totalorder %s49_s26, %s1329_s19  ;;  %p1334_p4 = scmp.lt.s32.totalorder %s49_s26, %s49_s26 }
   0xd   :  { %p1335_p5 = scmp.lt.s32.totalorder %s1333_s20, %s1329_s19 }
   0xf   :  { %p1336_p6 = por %p1335_p5, %p1334_p4 }
  0x11   :  { %p1337_p7 = pnand %p1336_p6, %p1330_p3 }
  0x13   :  { %1340 = shalt.err (!%p1337_p7)
}
  0x14   :  { %51 = dma.hbm_to_vmem [thread:$0]  %s1770_s6, 16, %s49_s26, [#allocation6]  }
  0x15   :  { %s1341_s25 = scalar_lea.hbm %s1768_s4, 16 }
  0x16   :  { %p1342_p8 = scmp.ne.s32.totalorder %s1768_s4, %s1341_s25  ;;  %p1345_p9 = scmp.lt.u32.totalorder %s1341_s25, %s1768_s4 }
  0x18   :  { %p1347_p10 = pnand %p1345_p9, %p1342_p8 }
  0x1a   :  { %1350 = shalt.err (!%p1347_p10)
}
  0x1b   :  { %s1351_s15 = scalar_lea.vmem %s37_s28, 16  ;;  %s1355_s16 = scalar_lea.vmem %s37_s28, 32 }
  0x1c   :  { %p1352_p11 = scmp.ne.s32.totalorder %s37_s28, %s1351_s15  ;;  %p1356_p12 = scmp.lt.s32.totalorder %s37_s28, %s37_s28 }
  0x1d   :  { %p1357_p13 = scmp.lt.s32.totalorder %s1355_s16, %s1351_s15 }
  0x1f   :  { %p1358_p0 = por %p1357_p13, %p1356_p12 }
  0x21   :  { %p1359_p1 = pnand %p1358_p0, %p1352_p11 }
  0x23   :  { %1362 = shalt.err (!%p1359_p1)
}
  0x24   :  { %39 = dma.hbm_to_vmem [thread:$0]  %s1768_s4, 16, %s37_s28, [#allocation3]  }
  0x25   :  { %s1439_s17 = smov [#allocation7]   ;;  %s1440_s19 = smov [#allocation8]  }
  0x26   :  { %s58_s18 = sshll.u32 %s1439_s17, 4  ;;  %s68_s20 = sshll.u32 %s1440_s19, 4  ;;  %s59_s18 = int_to_ptr.vmem [resolvable:$true] %s58_s18  ;;  %s69_s20 = int_to_ptr.vmem [resolvable:$true] %s68_s20 }
  0x27   :  { %s1363_s23 = scalar_lea.hbm %s1771_s7, 16 }
  0x28   :  { %p1364_p2 = scmp.ne.s32.totalorder %s1771_s7, %s1363_s23  ;;  %p1367_p3 = scmp.lt.u32.totalorder %s1363_s23, %s1771_s7 }
  0x2a   :  { %p1369_p4 = pnand %p1367_p3, %p1364_p2 }
  0x2c   :  { %1372 = shalt.err (!%p1369_p4)
}
  0x2d   :  { %s1373_s4 = scalar_lea.vmem %s59_s18, 16  ;;  %s1377_s28 = scalar_lea.vmem %s59_s18, 32 }
  0x2e   :  { %p1374_p5 = scmp.ne.s32.totalorder %s59_s18, %s1373_s4  ;;  %p1378_p6 = scmp.lt.s32.totalorder %s59_s18, %s59_s18 }
  0x2f   :  { %p1379_p7 = scmp.lt.s32.totalorder %s1377_s28, %s1373_s4 }
  0x31   :  { %p1380_p8 = por %p1379_p7, %p1378_p6 }
  0x33   :  { %p1381_p9 = pnand %p1380_p8, %p1374_p5 }
  0x35   :  { %1384 = shalt.err (!%p1381_p9)
}
  0x36   :  { %61 = dma.hbm_to_vmem [thread:$0]  %s1771_s7, 16, %s59_s18, [#allocation6]  }
  0x37   :  { %s1385_s6 = scalar_lea.hbm %s1772_s8, 16 }
  0x38   :  { %p1386_p10 = scmp.ne.s32.totalorder %s1772_s8, %s1385_s6  ;;  %p1389_p11 = scmp.lt.u32.totalorder %s1385_s6, %s1772_s8 }
  0x3a   :  { %p1391_p12 = pnand %p1389_p11, %p1386_p10 }
  0x3c   :  { %1394 = shalt.err (!%p1391_p12)
}
  0x3d   :  { %s1395_s22 = scalar_lea.vmem %s69_s20, 16  ;;  %s1399_s23 = scalar_lea.vmem %s69_s20, 32 }
  0x3e   :  { %p1396_p13 = scmp.ne.s32.totalorder %s69_s20, %s1395_s22  ;;  %p1400_p0 = scmp.lt.s32.totalorder %s69_s20, %s69_s20 }
  0x3f   :  { %p1401_p1 = scmp.lt.s32.totalorder %s1399_s23, %s1395_s22 }
  0x41   :  { %p1402_p2 = por %p1401_p1, %p1400_p0 }
  0x43   :  { %p1403_p3 = pnand %p1402_p2, %p1396_p13 }
  0x45   :  { %1406 = shalt.err (!%p1403_p3)
}
  0x46   :  { %71 = dma.hbm_to_vmem [thread:$0]  %s1772_s8, 16, %s69_s20, [#allocation9]  }
  0x47   :  { %1429 = dma.done.wait [#allocation3], 16  }
  0x48   :  { %1430 = vsyncadd [#allocation3], 4294967280 }
  0x49   :  { %1431 = dma.done.wait [#allocation6], 32  }
  0x4a   :  { %1432 = vsyncadd [#allocation6], 4294967264 }
  0x4b   :  { %1433 = dma.done.wait [#allocation9], 16  }
  0x4c   :  { %1434 = vsyncadd [#allocation9], 4294967280  ;;  %vm97_vm0 = vcmask 261120   ;;  %v1574_v0 = vld [vmem:[%s1764_s0] sm:$0xff]  ;;  %v1579_v1 = vld [vmem:[%s1764_s0 + $0x8] sm:$0xff]  ;;  %v1441_v15 = vmov 0.0   ;;  %v233_v63 = vlaneseq }
  0x4d   :  { %v98_v2 = vsel %vm97_vm0, %v1574_v0, 0.0  ;;  %v101_v3 = vsel %vm97_vm0, %v1579_v1, 0.0  ;;  %v1265_v14 = vld [vmem:[%s1767_s3] sm:$0xff]   ;;  %1135 = vmatprep.subr.bf16.mxu0 %v1441_v15  ;;  %1143 = vmatprep.subr.bf16.mxu1 %v1441_v15  ;;  %v1266_v16 = vld [vmem:[%s1767_s3 + $0x8] sm:$0xff]   ;;  %vm1442_vm1 = vmmov 0   ;;  %s1445_s15 = smov 104  }
  0x4e   :  { %99 = vadd.xlane.f32.xlu0 %v98_v2  ;;  %1136 = vmatpush3.bf16.msra.mxu0 %v1265_v14  ;;  %v1075_v25 = vld [vmem:[%s1765_s1] ss:$0 sm:$0xff]  ;;  %s1443_s1 = smov 112   ;;  %s1446_s16 = smov 96   ;;  %vm265_vm2 = vcmask 64512   ;;  %v234_v2 = vshrl.u32 %v233_v63, 7 }
  0x4f   :  { %1139 = vmatprep.mubr.msk.bf16.mxu0 %vm1442_vm1, %v1441_v15  ;;  %1137 = vmatprep.subr.bf16.mxu0 %v1441_v15  ;;  %v1076_v29 = vld [vmem:[%s1766_s2] ss:$0 sm:$0xff]  ;;  %s1444_s2 = smov 120   ;;  %vm463_vm5 = vcmask 130048   ;;  %s1447_s6 = smov 64   ;;  %vm772_vm6 = vcmask 195584  }
  0x50   :  { %1145 = vmatprep.mubr.msk.bf16.mxu1 %vm1442_vm1, %v1441_v15  ;;  %v1077_v34 = vld [vmem:[#allocation2] ss:$0 sm:$0xff]  ;;  %s1448_s22 = smov 8   ;;  %s1449_s23 = smov 16   ;;  %vm1007_vm7 = vcmask 523264  }
  0x51   :  { %s1451_s14 = smov [#allocation10]  }
  0x52   :  { %102 = vadd.xlane.f32.xlu0 %v101_v3  ;;  %1138 = vmatpush3.bf16.msra.mxu0 %v1266_v16  ;;  %v239_v3 = vand.u32 127, %v233_v63 }
  0x53   :  { %1149 = vmatprep.subr.bf16.mxu0 %v1441_v15 }
  0xdb   :  { %v100_v4 = vpop.xlane.xlu0 %99 }
  0xdc   :  { %v105_v5 = vmul.f32 0.03125, %v100_v4  ;;  %v235_v4 = vadd.s32 8, %v234_v2 }
  0xde   :  { %v107_v6 = vsub.f32 %v1574_v0, %v105_v5  ;;  %v236_v5 = vcvt.s32.f32 %v234_v2 }
  0xdf   :  { %v103_v7 = vpop.xlane.xlu0 %102 }
  0xe0   :  { %v106_v8 = vmul.f32 0.03125, %v103_v7  ;;  %v109_v9 = vmul.f32 %v107_v6, %v107_v6  ;;  %v237_v7 = vcvt.s32.f32 %v235_v4 }
  0xe2   :  { %v108_v10 = vsub.f32 %v1579_v1, %v106_v8  ;;  %v111_v11 = vsel %vm97_vm0, %v109_v9, 0.0  ;;  %v249_v9 = vadd.f32 0.5, %v236_v5 }
  0xe3   :  { %112 = vadd.xlane.f32.xlu1 %v111_v11 }
  0xe4   :  { %v110_v12 = vmul.f32 %v108_v10, %v108_v10  ;;  %v251_v14 = vmul.f32 0.125, %v249_v9 }
  0xe6   :  { %v114_v13 = vsel %vm97_vm0, %v110_v12, 0.0  ;;  %v250_v12 = vadd.f32 0.5, %v237_v7 }
  0xe7   :  { %115 = vadd.xlane.f32.xlu1 %v114_v13 }
 0x170   :  { %v113_v17 = vpop.xlane.xlu1 %112 }
 0x171   :  { %v117_v18 = vmul.f32 0.03125, %v113_v17 }
 0x173   :  { %v119_v19 = vadd.f32 1e-05, %v117_v18  ;;  %v252_v18 = vmul.f32 0.125, %v250_v12 }
 0x174   :  { %v116_v20 = vpop.xlane.xlu1 %115 }
 0x175   :  { %1275 = vrsqrt.f32 %v119_v19  ;;  %v118_v21 = vmul.f32 0.03125, %v116_v20  ;;  %v253_v20 = vfloor.f32 %v251_v14 }
 0x177   :  { %v120_v22 = vadd.f32 1e-05, %v118_v21 }
 0x179   :  { %1277 = vrsqrt.f32 %v120_v22 }
 0x17f   :  { %v1276_v23 = vpop.eup %1275 }
 0x180   :  { %v123_v24 = vmul.f32 %v1276_v23, %v107_v6  ;;  %v240_v6 = vcvt.s32.f32 %v239_v3  ;;  %v254_v23 = vfloor.f32 %v252_v18 }
 0x182   :  { %v131_v28 = vmul.f32 %v1075_v25, %v123_v24  ;;  %v241_v8 = vsub.f32 %v236_v5, %v240_v6  ;;  %v242_v11 = vsub.f32 %v237_v7, %v240_v6 }
 0x183   :  { %v1278_v26 = vpop.eup %1277 }
 0x184   :  { %v124_v27 = vmul.f32 %v1278_v26, %v108_v10  ;;  %v139_v31 = vadd.f32 %v1076_v29, %v131_v28  ;;  %v255_v10 = vadd.f32 0.5, %v240_v6  ;;  %v243_v13 = vmax.f32 %v241_v8, 0.0 }
 0x185   :  { %v244_v17 = vmax.f32 %v242_v11, 0.0 }
 0x186   :  { %v132_v30 = vmul.f32 %v1075_v25, %v124_v27  ;;  %v256_v16 = vmul.f32 0.125, %v255_v10  ;;  %v245_v19 = vmul.f32 %v243_v13, %v243_v13 }
 0x187   :  { %v246_v22 = vmul.f32 %v244_v17, %v244_v17 }
 0x188   :  { %v140_v32 = vadd.f32 %v1076_v29, %v132_v30  ;;  %v257_v21 = vfloor.f32 %v256_v16  ;;  %v247_v24 = vsub.f32 0.0, %v245_v19 }
 0x189   :  { %v248_v25 = vsub.f32 0.0, %v246_v22 }
 0x18a   :  { %v141_v33 = vpack.c.bf16 %v140_v32, %v139_v31  ;;  %vm258_vm3 = vcmp.eq.f32.partialorder %v253_v20, %v257_v21  ;;  %vm259_vm4 = vcmp.eq.f32.partialorder %v254_v23, %v257_v21 }
 0x18b   :  { %v260_v26 = vsel %vm258_vm3, %v247_v24, -1e+30  ;;  %v261_v28 = vsel %vm259_vm4, %v248_v25, -1e+30 }
 0x18c   :  { %1140 = vmatmul.mubr.msk.bf16.vlgmr.msra.gmra.mrb[0].mxu0 %vm97_vm0, %v141_v33 }
 0x18d   :  { %1151 = vmatprep.mubr.msk.bf16.mxu0 %vm1442_vm1, %v1441_v15 }
 0x25f   :  { %v202_v35 = vpop.f32.mrb[0].mxu0 }
 0x260   :  { %v1141_v36 = vpop.f32.mrb[1].mxu0  ;;  %v203_v38 = vadd.f32 %v1077_v34, %v202_v35 }
 0x261   :  { %v205_v37 = vpop.f32.mrb[2].mxu0 }
 0x262   :  { %v206_v39 = vadd.f32 %v1077_v34, %v205_v37  ;;  %v1142_v40 = vpop.f32.mrb[3].mxu0 }
 0x264   :  { %v1240_v41 = vpack.i.bf16 %v206_v39, %v203_v38  ;;  %v1612_v42 = vpack.c.bf16 %v206_v39, %v203_v38 }
 0x266   :  { %1241 = vrot.lane.b32.xlu1 %v1240_v41, %s1443_s1  ;;  %1236 = vrot.lane.b32.xlu0 %v1240_v41, %s1444_s2  ;;  %s1061_s1 = sshll.u32 %s1451_s14, 4  ;;  %s1062_s1 = int_to_ptr.vmem [resolvable:$true] %s1061_s1 }
 0x267   :  { %s1407_s2 = scalar_lea.vmem %s1062_s1, 256  ;;  %p1412_p5 = scmp.lt.s32.totalorder %s1062_s1, %s1062_s1 }
 0x268   :  { %p1408_p4 = scmp.ne.s32.totalorder %s1062_s1, %s1407_s2  ;;  %p1413_p6 = scmp.lt.s32.totalorder %s1407_s2, %s1407_s2 }
 0x26a   :  { %1246 = vrot.lane.b32.xlu1 %v1240_v41, %s1445_s15  ;;  %p1414_p7 = por %p1413_p6, %p1412_p5 }
 0x26c   :  { %p1415_p8 = pnand %p1414_p7, %p1408_p4 }
 0x26e   :  { %263 = vrot.lane.b32.xlu1 %v1612_v42, %s1446_s16 }
 0x2d8   :  { %v1242_v43 = vpop.permute.xlu1 %1241  ;;  %v1237_v44 = vpop.permute.xlu0 %1236 }
 0x2d9   :  { %v1244_v45 = vunpack.i.h.bf16 %v1242_v43  ;;  %v1243_v46 = vunpack.i.l.bf16 %v1242_v43  ;;  %v1239_v47 = vunpack.i.h.bf16 %v1237_v44  ;;  %v1238_v48 = vunpack.i.l.bf16 %v1237_v44 }
 0x2db   :  { %v1615_v49 = vpack.c.bf16 %v1244_v45, %v1243_v46  ;;  %v1617_v50 = vpack.c.bf16 %v1239_v47, %v1238_v48 }
 0x2dc   :  { %v1247_v51 = vpop.permute.xlu1 %1246 }
 0x2dd   :  { %v1249_v52 = vunpack.i.h.bf16 %v1247_v51  ;;  %v1248_v53 = vunpack.i.l.bf16 %v1247_v51  ;;  %314 = vrot.lane.b32.xlu0 %v1617_v50, %s1446_s16  ;;  %364 = vrot.lane.b32.xlu1 %v1615_v49, %s1446_s16 }
 0x2df   :  { %v1621_v54 = vpack.c.bf16 %v1249_v52, %v1248_v53 }
 0x2e0   :  { %v264_v55 = vpop.permute.xlu1 %263 }
 0x2e1   :  { %414 = vrot.lane.b32.xlu0 %v1621_v54, %s1446_s16  ;;  %v270_v56 = vsel %vm265_vm2, %v264_v55, 0 }
 0x2e2   :  { %1144 = vmatpush3.bf16.xpose.msra.mxu1 %v270_v56 }
 0x2e3   :  { %1155 = vmatprep.subr.bf16.mxu1 %v1441_v15 }
 0x2e9   :  { %1146 = vmatmul.mubr.msk.bf16.vlgmr.msra.gmra.mrb[0].mxu1 %vm265_vm2, %v1612_v42 }
 0x2ea   :  { %1157 = vmatprep.mubr.msk.bf16.mxu1 %vm1442_vm1, %v1441_v15 }
 0x34f   :  { %v315_v57 = vpop.permute.xlu0 %314  ;;  %v365_v58 = vpop.permute.xlu1 %364 }
 0x350   :  { %v320_v59 = vsel %vm265_vm2, %v315_v57, 0  ;;  %v370_v60 = vsel %vm265_vm2, %v365_v58, 0 }
 0x351   :  { %1150 = vmatpush3.bf16.xpose.msra.mxu0 %v320_v59  ;;  %1156 = vmatpush3.bf16.xpose.msra.mxu1 %v370_v60 }
 0x352   :  { %1161 = vmatprep.subr.bf16.mxu0 %v1441_v15  ;;  %1167 = vmatprep.subr.bf16.mxu1 %v1441_v15 }
 0x353   :  { %v415_v61 = vpop.permute.xlu0 %414 }
 0x354   :  { %v420_v62 = vsel %vm265_vm2, %v415_v61, 0 }
 0x358   :  { %1152 = vmatmul.mubr.msk.bf16.vlgmr.msra.gmra.mrb[4].mxu0 %vm265_vm2, %v1617_v50  ;;  %1158 = vmatmul.mubr.msk.bf16.vlgmr.msra.gmra.mrb[4].mxu1 %vm265_vm2, %v1615_v49 }
 0x359   :  { %1162 = vmatpush3.bf16.xpose.msra.mxu0 %v420_v62  ;;  %1163 = vmatprep.mubr.msk.bf16.mxu0 %vm1442_vm1, %v1441_v15 }
 0x35a   :  { %1169 = vmatprep.mubr.msk.bf16.mxu1 %vm1442_vm1, %v1441_v15  ;;  %1173 = vmatprep.subr.bf16.mxu0 %v1441_v15 }
 0x360   :  { %1164 = vmatmul.mubr.msk.bf16.vlgmr.msra.gmra.mrb[8].mxu0 %vm265_vm2, %v1621_v54 }
 0x361   :  { %1175 = vmatprep.mubr.msk.bf16.mxu0 %vm1442_vm1, %v1441_v15 }
 0x3bc   :  { %v306_v27 = vpop.f32.mrb[0].mxu1 }
 0x3bd   :  { %v307_v29 = vadd.f32 %v306_v27, %v260_v26  ;;  %v1147_v30 = vpop.f32.mrb[1].mxu1 }
 0x3be   :  { %v309_v31 = vpop.f32.mrb[2].mxu1 }
 0x3bf   :  { %v310_v32 = vadd.f32 %v309_v31, %v261_v28  ;;  %v1148_v33 = vpop.f32.mrb[3].mxu1  ;;  %v464_v34 = vsel %vm463_vm5, %v307_v29, -inf }
 0x3c0   :  { %465 = vmax.xlane.f32.xlu1 %v464_v34 }
 0x3c1   :  { %v467_v35 = vsel %vm463_vm5, %v310_v32, -inf }
 0x3c2   :  { %468 = vmax.xlane.f32.xlu0 %v467_v35 }
 0x42b   :  { %v356_v36 = vpop.f32.mrb[4].mxu0  ;;  %v406_v37 = vpop.f32.mrb[4].mxu1 }
 0x42c   :  { %v357_v38 = vadd.f32 %v356_v36, %v260_v26  ;;  %v407_v39 = vadd.f32 %v406_v37, %v260_v26  ;;  %v1153_v40 = vpop.f32.mrb[5].mxu0  ;;  %v1159_v41 = vpop.f32.mrb[5].mxu1 }
 0x42d   :  { %v359_v43 = vpop.f32.mrb[6].mxu0  ;;  %v409_v44 = vpop.f32.mrb[6].mxu1 }
 0x42e   :  { %v360_v45 = vadd.f32 %v359_v43, %v261_v28  ;;  %v1154_v46 = vpop.f32.mrb[7].mxu0  ;;  %v1160_v47 = vpop.f32.mrb[7].mxu1  ;;  %v476_v48 = vsel %vm463_vm5, %v407_v39, -inf  ;;  %v470_v51 = vsel %vm463_vm5, %v357_v38, -inf  ;;  %v410_v52 = vadd.f32 %v409_v44, %v261_v28 }
 0x42f   :  { %477 = vmax.xlane.f32.xlu1 %v476_v48  ;;  %471 = vmax.xlane.f32.xlu0 %v470_v51 }
 0x430   :  { %v473_v53 = vsel %vm463_vm5, %v360_v45, -inf  ;;  %v479_v61 = vsel %vm463_vm5, %v410_v52, -inf }
 0x433   :  { %474 = vmax.xlane.f32.xlu0 %v473_v53  ;;  %v456_v55 = vpop.f32.mrb[8].mxu0 }
 0x434   :  { %v457_v56 = vadd.f32 %v456_v55, %v260_v26  ;;  %v1165_v57 = vpop.f32.mrb[9].mxu0 }
 0x435   :  { %v459_v58 = vpop.f32.mrb[10].mxu0 }
 0x436   :  { %v460_v59 = vadd.f32 %v459_v58, %v261_v28  ;;  %v1166_v60 = vpop.f32.mrb[11].mxu0  ;;  %v482_v62 = vsel %vm463_vm5, %v457_v56, -inf }
 0x437   :  { %480 = vmax.xlane.f32.xlu0 %v479_v61  ;;  %483 = vmax.xlane.f32.xlu1 %v482_v62 }
 0x438   :  { %v485_v63 = vsel %vm463_vm5, %v460_v59, -inf }
 0x43b   :  { %486 = vmax.xlane.f32.xlu0 %v485_v63 }
 0x448   :  { %556 = vrot.lane.b32.xlu1 %v1612_v42, %s1447_s6 }
 0x44d   :  { %v466_v5 = vpop.xlane.xlu1 %465 }
 0x44e   :  { %v488_v6 = vsub.f32 %v307_v29, %v466_v5 }
 0x44f   :  { %v469_v2 = vpop.xlane.xlu0 %468 }
 0x450   :  { %v489_v3 = vsub.f32 %v310_v32, %v469_v2  ;;  %v496_v7 = vmul.f32 1.442695, %v488_v6 }
 0x452   :  { %v498_v4 = vmul.f32 1.442695, %v489_v3 }
 0x454   :  { %1279 = vpow2.f32 %v498_v4 }
 0x455   :  { %1281 = vpow2.f32 %v496_v7 }
 0x45e   :  { %v1280_v8 = vpop.eup %1279 }
 0x45f   :  { %v515_v9 = vsel %vm463_vm5, %v1280_v8, 0.0  ;;  %v1282_v10 = vpop.eup %1281 }
 0x460   :  { %516 = vadd.xlane.f32.xlu0 %v515_v9  ;;  %v512_v11 = vsel %vm463_vm5, %v1282_v10, 0.0 }
 0x46c   :  { %513 = vadd.xlane.f32.xlu1 %v512_v11 }
 0x4bc   :  { %v478_v12 = vpop.xlane.xlu1 %477  ;;  %v472_v13 = vpop.xlane.xlu0 %471 }
 0x4bd   :  { %v492_v14 = vsub.f32 %v407_v39, %v478_v12  ;;  %v490_v42 = vsub.f32 %v357_v38, %v472_v13 }
 0x4bf   :  { %v500_v16 = vmul.f32 1.442695, %v490_v42  ;;  %v504_v17 = vmul.f32 1.442695, %v492_v14 }
 0x4c0   :  { %v475_v18 = vpop.xlane.xlu0 %474 }
 0x4c1   :  { %v491_v19 = vsub.f32 %v360_v45, %v475_v18  ;;  %1283 = vpow2.f32 %v500_v16 }
 0x4c2   :  { %1285 = vpow2.f32 %v504_v17  ;;  %v1267_v17 = vld [vmem:[%s1769_s5] sm:$0xff]  }
 0x4c3   :  { %v502_v20 = vmul.f32 1.442695, %v491_v19 }
 0x4c4   :  { %v481_v21 = vpop.xlane.xlu0 %480  ;;  %v484_v22 = vpop.xlane.xlu1 %483 }
 0x4c5   :  { %1287 = vpow2.f32 %v502_v20  ;;  %v493_v23 = vsub.f32 %v410_v52, %v481_v21  ;;  %v494_v24 = vsub.f32 %v457_v56, %v484_v22  ;;  %v1268_v20 = vld [vmem:[%s1769_s5 + $0x8] sm:$0xff]   ;;  %s1450_s5 = smov 24  }
 0x4c7   :  { %v506_v25 = vmul.f32 1.442695, %v493_v23  ;;  %v508_v26 = vmul.f32 1.442695, %v494_v24 }
 0x4c8   :  { %v557_v27 = vpop.permute.xlu1 %556  ;;  %v487_v28 = vpop.xlane.xlu0 %486 }
 0x4c9   :  { %1289 = vpow2.f32 %v506_v25  ;;  %v495_v29 = vsub.f32 %v460_v59, %v487_v28  ;;  %1168 = vmatpush3.bf16.msra.mxu1 %v557_v27 }
 0x4ca   :  { %1291 = vpow2.f32 %v508_v26  ;;  %1179 = vmatprep.subr.bf16.mxu1 %v1441_v15 }
 0x4cb   :  { %v510_v30 = vmul.f32 1.442695, %v495_v29  ;;  %v1284_v31 = vpop.eup %1283 }
 0x4cc   :  { %v518_v32 = vsel %vm463_vm5, %v1284_v31, 0.0  ;;  %v1286_v33 = vpop.eup %1285 }
 0x4cd   :  { %1293 = vpow2.f32 %v510_v30  ;;  %519 = vadd.xlane.f32.xlu1 %v518_v32  ;;  %v524_v36 = vsel %vm463_vm5, %v1286_v33, 0.0 }
 0x4cf   :  { %v1288_v34 = vpop.eup %1287 }
 0x4d0   :  { %v521_v35 = vsel %vm463_vm5, %v1288_v34, 0.0 }
 0x4d1   :  { %522 = vadd.xlane.f32.xlu0 %v521_v35  ;;  %525 = vadd.xlane.f32.xlu1 %v524_v36 }
 0x4d3   :  { %v1290_v37 = vpop.eup %1289 }
 0x4d4   :  { %v1292_v38 = vpop.eup %1291  ;;  %v527_v39 = vsel %vm463_vm5, %v1290_v37, 0.0 }
 0x4d5   :  { %v530_v40 = vsel %vm463_vm5, %v1292_v38, 0.0  ;;  %528 = vadd.xlane.f32.xlu0 %v527_v39 }
 0x4d6   :  { %531 = vadd.xlane.f32.xlu1 %v530_v40 }
 0x4d7   :  { %v1294_v41 = vpop.eup %1293 }
 0x4d8   :  { %v533_v43 = vsel %vm463_vm5, %v1294_v41, 0.0 }
 0x4d9   :  { %534 = vadd.xlane.f32.xlu0 %v533_v43 }
 0x4e7   :  { %650 = vrot.lane.b32.xlu1 %v1615_v49, %s1447_s6 }
 0x4eb   :  { %697 = vrot.lane.b32.xlu1 %v1621_v54, %s1447_s6 }
 0x4ed   :  { %v517_v44 = vpop.xlane.xlu0 %516 }
 0x4ee   :  { %1295 = vrcp.f32 %v517_v44 }
 0x4ef   :  { %603 = vrot.lane.b32.xlu0 %v1617_v50, %s1447_s6 }
 0x4f8   :  { %v1296_v46 = vpop.eup %1295 }
 0x4f9   :  { %v514_v45 = vpop.xlane.xlu1 %513  ;;  %v545_v48 = vmul.f32 %v1296_v46, %v1280_v8 }
 0x4fa   :  { %1297 = vrcp.f32 %v514_v45 }
 0x504   :  { %v1298_v47 = vpop.eup %1297 }
 0x505   :  { %v544_v51 = vmul.f32 %v1298_v47, %v1282_v10 }
 0x507   :  { %v552_v52 = vpack.c.bf16 %v545_v48, %v544_v51 }
 0x509   :  { %1170 = vmatmul.mubr.msk.bf16.vlgmr.msra.gmra.mrb[8].mxu1 %vm463_vm5, %v552_v52 }
 0x50a   :  { %1181 = vmatprep.mubr.msk.bf16.mxu1 %vm1442_vm1, %v1441_v15 }
 0x55a   :  { %v520_v49 = vpop.xlane.xlu1 %519 }
 0x55b   :  { %1299 = vrcp.f32 %v520_v49  ;;  %v1089_v49 = vld [vmem:[#allocation5] ss:$0 sm:$0xff] }
 0x55e   :  { %v523_v54 = vpop.xlane.xlu0 %522  ;;  %v526_v53 = vpop.xlane.xlu1 %525 }
 0x55f   :  { %1301 = vrcp.f32 %v523_v54 }
 0x560   :  { %1303 = vrcp.f32 %v526_v53 }
 0x562   :  { %v529_v50 = vpop.xlane.xlu0 %528 }
 0x563   :  { %v532_v55 = vpop.xlane.xlu1 %531  ;;  %1305 = vrcp.f32 %v529_v50 }
 0x564   :  { %1307 = vrcp.f32 %v532_v55 }
 0x565   :  { %v1300_v57 = vpop.eup %1299 }
 0x566   :  { %v535_v56 = vpop.xlane.xlu0 %534  ;;  %v546_v60 = vmul.f32 %v1300_v57, %v1284_v31 }
 0x567   :  { %v651_v58 = vpop.permute.xlu1 %650  ;;  %1309 = vrcp.f32 %v535_v56 }
 0x568   :  { %1180 = vmatpush3.bf16.msra.mxu1 %v651_v58 }
 0x569   :  { %v1302_v59 = vpop.eup %1301  ;;  %1191 = vmatprep.subr.bf16.mxu1 %v1441_v15 }
 0x56a   :  { %v547_v61 = vmul.f32 %v1302_v59, %v1288_v34  ;;  %v604_v62 = vpop.permute.xlu0 %603  ;;  %v1304_v63 = vpop.eup %1303 }
 0x56b   :  { %1174 = vmatpush3.bf16.msra.mxu0 %v604_v62  ;;  %v548_v4 = vmul.f32 %v1304_v63, %v1286_v33  ;;  %v698_v6 = vpop.permute.xlu1 %697 }
 0x56c   :  { %v553_v2 = vpack.c.bf16 %v547_v61, %v546_v60  ;;  %1185 = vmatprep.subr.bf16.mxu0 %v1441_v15 }
 0x56d   :  { %v1306_v3 = vpop.eup %1305 }
 0x56e   :  { %v549_v5 = vmul.f32 %v1306_v3, %v1290_v37  ;;  %1176 = vmatmul.mubr.msk.bf16.vlgmr.msra.gmra.mrb[12].mxu0 %vm463_vm5, %v553_v2  ;;  %v1308_v7 = vpop.eup %1307 }
 0x56f   :  { %1186 = vmatpush3.bf16.msra.mxu0 %v698_v6  ;;  %1187 = vmatprep.mubr.msk.bf16.mxu0 %vm1442_vm1, %v1441_v15  ;;  %v550_v10 = vmul.f32 %v1308_v7, %v1292_v38 }
 0x570   :  { %v554_v8 = vpack.c.bf16 %v549_v5, %v548_v4  ;;  %1199 = vmatprep.subr.bf16.mxu0 %v1441_v15 }
 0x571   :  { %v1310_v9 = vpop.eup %1309 }
 0x572   :  { %v551_v11 = vmul.f32 %v1310_v9, %v1294_v41  ;;  %1182 = vmatmul.mubr.msk.bf16.vlgmr.msra.gmra.mrb[12].mxu1 %vm463_vm5, %v554_v8  ;;  %v1269_v8 = vld [vmem:[%s1773_s9] sm:$0xff]   ;;  %v1270_v9 = vld [vmem:[%s1773_s9 + $0x8] sm:$0xff]  }
 0x573   :  { %1195 = vmatprep.mubr.msk.bf16.mxu1 %vm1442_vm1, %v1441_v15  ;;  %1192 = vmatpush3.bf16.msra.mxu1 %v1267_v17 }
 0x574   :  { %v555_v12 = vpack.c.bf16 %v551_v11, %v550_v10  ;;  %1193 = vmatprep.subr.bf16.mxu1 %v1441_v15 }
 0x576   :  { %1188 = vmatmul.mubr.msk.bf16.vlgmr.msra.gmra.mrb[16].mxu0 %vm463_vm5, %v555_v12 }
 0x577   :  { %1203 = vmatprep.mubr.msk.bf16.mxu0 %vm1442_vm1, %v1441_v15  ;;  %1194 = vmatpush3.bf16.msra.mxu1 %v1268_v20 }
 0x578   :  { %1207 = vmatprep.subr.bf16.mxu1 %v1441_v15  ;;  %1200 = vmatpush3.bf16.msra.mxu0 %v1269_v8 }
 0x579   :  { %1201 = vmatprep.subr.bf16.mxu0 %v1441_v15 }
 0x57c   :  { %1202 = vmatpush3.bf16.msra.mxu0 %v1270_v9 }
 0x5dc   :  { %v596_v13 = vpop.f32.mrb[8].mxu1 }
 0x5dd   :  { %v1171_v14 = vpop.f32.mrb[9].mxu1 }
 0x5de   :  { %v599_v42 = vpop.f32.mrb[10].mxu1 }
 0x5df   :  { %v1172_v16 = vpop.f32.mrb[11].mxu1 }
 0x641   :  { %v643_v18 = vpop.f32.mrb[12].mxu0 }
 0x642   :  { %v1177_v19 = vpop.f32.mrb[13].mxu0 }
 0x643   :  { %v646_v21 = vpop.f32.mrb[14].mxu0 }
 0x644   :  { %v1250_v22 = vpack.i.bf16 %v646_v21, %v643_v18  ;;  %v1178_v23 = vpop.f32.mrb[15].mxu0  ;;  %v1093_v18 = vld [vmem:[#allocation7] ss:$0 sm:$0xff] }
 0x645   :  { %v690_v24 = vpop.f32.mrb[12].mxu1 }
 0x646   :  { %v1183_v25 = vpop.f32.mrb[13].mxu1  ;;  %1251 = vrot.lane.b32.xlu1 %v1250_v22, %s1448_s22  ;;  %v1094_v22 = vld [vmem:[#allocation8] ss:$0 sm:$0xff] }
 0x647   :  { %v693_v26 = vpop.f32.mrb[14].mxu1 }
 0x648   :  { %v1255_v27 = vpack.i.bf16 %v693_v26, %v690_v24  ;;  %v1184_v28 = vpop.f32.mrb[15].mxu1 }
 0x649   :  { %v737_v29 = vpop.f32.mrb[16].mxu0  ;;  %v1272_v28 = vld [vmem:[%s1775_s11 + $0x8] sm:$0xff]  }
 0x64a   :  { %1256 = vrot.lane.b32.xlu0 %v1255_v27, %s1449_s23  ;;  %v1189_v30 = vpop.f32.mrb[17].mxu0  ;;  %v1271_v27 = vld [vmem:[%s1775_s11] sm:$0xff]  }
 0x64b   :  { %v740_v31 = vpop.f32.mrb[18].mxu0  ;;  %v1274_v30 = vld [vmem:[%s1775_s11 + $0x18] sm:$0xff]  }
 0x64c   :  { %v1260_v32 = vpack.i.bf16 %v740_v31, %v737_v29  ;;  %v1190_v33 = vpop.f32.mrb[19].mxu0  ;;  %v1273_v29 = vld [vmem:[%s1775_s11 + $0x10] sm:$0xff]   ;;  %v1095_v31 = vld [vmem:[%s1774_s10] ss:$0 sm:$0xff] }
 0x64e   :  { %1261 = vrot.lane.b32.xlu1 %v1260_v32, %s1450_s5 }
 0x6b8   :  { %v1252_v34 = vpop.permute.xlu1 %1251 }
 0x6b9   :  { %v1254_v36 = vunpack.i.h.bf16 %v1252_v34  ;;  %v1253_v37 = vunpack.i.l.bf16 %v1252_v34 }
 0x6bb   :  { %v769_v41 = vsel %vm265_vm2, %v599_v42, %v1254_v36  ;;  %v768_v43 = vsel %vm265_vm2, %v596_v13, %v1253_v37 }
 0x6bc   :  { %v1257_v35 = vpop.permute.xlu0 %1256 }
 0x6bd   :  { %v1259_v38 = vunpack.i.h.bf16 %v1257_v35  ;;  %v1258_v39 = vunpack.i.l.bf16 %v1257_v35 }
 0x6bf   :  { %v770_v46 = vsel %vm463_vm5, %v768_v43, %v1258_v39  ;;  %v771_v47 = vsel %vm463_vm5, %v769_v41, %v1259_v38 }
 0x6c0   :  { %v1262_v40 = vpop.permute.xlu1 %1261 }
 0x6c1   :  { %v1264_v44 = vunpack.i.h.bf16 %v1262_v40  ;;  %v1263_v45 = vunpack.i.l.bf16 %v1262_v40 }
 0x6c3   :  { %v774_v48 = vsel %vm772_vm6, %v771_v47, %v1264_v44  ;;  %v773_v51 = vsel %vm772_vm6, %v770_v46, %v1263_v45 }
 0x6c4   :  { %v775_v52 = vpack.c.bf16 %v774_v48, %v773_v51  ;;  %v1099_v51 = vld [vmem:[%s1776_s12] ss:$0 sm:$0xff] }
 0x6c6   :  { %1196 = vmatmul.mubr.msk.bf16.vlgmr.msra.gmra.mrb[16].mxu1 %vm97_vm0, %v775_v52 }
 0x6c7   :  { %1215 = vmatprep.mubr.msk.bf16.mxu1 %vm1442_vm1, %v1441_v15  ;;  %1208 = vmatpush3.bf16.msra.mxu1 %v1271_v27 }
 0x6c8   :  { %1209 = vmatprep.subr.bf16.mxu1 %v1441_v15 }
 0x6cb   :  { %1210 = vmatpush3.bf16.msra.mxu1 %v1272_v28 }
 0x6cc   :  { %1211 = vmatprep.subr.bf16.mxu1 %v1441_v15 }
 0x6cf   :  { %1212 = vmatpush3.bf16.msra.mxu1 %v1273_v29 }
 0x6d0   :  { %1213 = vmatprep.subr.bf16.mxu1 %v1441_v15 }
 0x6d3   :  { %1214 = vmatpush3.bf16.msra.mxu1 %v1274_v30 }
 0x799   :  { %v836_v54 = vpop.f32.mrb[16].mxu1 }
 0x79a   :  { %v837_v53 = vadd.f32 %v1089_v49, %v836_v54  ;;  %v1197_v50 = vpop.f32.mrb[17].mxu1 }
 0x79b   :  { %v839_v55 = vpop.f32.mrb[18].mxu1 }
 0x79c   :  { %v1705_v56 = vadd.f32 %v837_v53, %v1574_v0  ;;  %v840_v57 = vadd.f32 %v1089_v49, %v839_v55  ;;  %v1198_v58 = vpop.f32.mrb[19].mxu1 }
 0x79e   :  { %v1708_v59 = vadd.f32 %v840_v57, %v1579_v1  ;;  %v847_v60 = vsel %vm97_vm0, %v1705_v56, 0.0 }
 0x79f   :  { %848 = vadd.xlane.f32.xlu0 %v847_v60 }
 0x7a0   :  { %v850_v61 = vsel %vm97_vm0, %v1708_v59, 0.0 }
 0x7a1   :  { %851 = vadd.xlane.f32.xlu1 %v850_v61 }
 0x82c   :  { %v849_v62 = vpop.xlane.xlu0 %848 }
 0x82d   :  { %v853_v63 = vmul.f32 0.03125, %v849_v62 }
 0x82e   :  { %v852_v2 = vpop.xlane.xlu1 %851 }
 0x82f   :  { %v855_v3 = vsub.f32 %v1705_v56, %v853_v63  ;;  %v854_v0 = vmul.f32 0.03125, %v852_v2 }
 0x831   :  { %v856_v4 = vsub.f32 %v1708_v59, %v854_v0  ;;  %v857_v5 = vmul.f32 %v855_v3, %v855_v3 }
 0x833   :  { %v859_v1 = vsel %vm97_vm0, %v857_v5, 0.0  ;;  %v858_v6 = vmul.f32 %v856_v4, %v856_v4 }
 0x834   :  { %860 = vadd.xlane.f32.xlu0 %v859_v1 }
 0x835   :  { %v862_v7 = vsel %vm97_vm0, %v858_v6, 0.0 }
 0x838   :  { %863 = vadd.xlane.f32.xlu0 %v862_v7 }
 0x8c1   :  { %v861_v10 = vpop.xlane.xlu0 %860 }
 0x8c2   :  { %v865_v11 = vmul.f32 0.03125, %v861_v10 }
 0x8c4   :  { %v867_v12 = vadd.f32 1e-05, %v865_v11 }
 0x8c5   :  { %v864_v13 = vpop.xlane.xlu0 %863 }
 0x8c6   :  { %1311 = vrsqrt.f32 %v867_v12  ;;  %v866_v14 = vmul.f32 0.03125, %v864_v13 }
 0x8c8   :  { %v868_v42 = vadd.f32 1e-05, %v866_v14 }
 0x8ca   :  { %1313 = vrsqrt.f32 %v868_v42 }
 0x8d0   :  { %v1312_v16 = vpop.eup %1311 }
 0x8d1   :  { %v871_v17 = vmul.f32 %v1312_v16, %v855_v3 }
 0x8d3   :  { %v879_v20 = vmul.f32 %v1093_v18, %v871_v17 }
 0x8d4   :  { %v1314_v19 = vpop.eup %1313 }
 0x8d5   :  { %v872_v21 = vmul.f32 %v1314_v19, %v856_v4  ;;  %v887_v24 = vadd.f32 %v1094_v22, %v879_v20 }
 0x8d7   :  { %v880_v23 = vmul.f32 %v1093_v18, %v872_v21 }
 0x8d9   :  { %v888_v25 = vadd.f32 %v1094_v22, %v880_v23 }
 0x8db   :  { %v889_v26 = vpack.c.bf16 %v888_v25, %v887_v24 }
 0x8dd   :  { %1204 = vmatmul.mubr.msk.bf16.vlgmr.msra.gmra.mrb[20].mxu0 %vm97_vm0, %v889_v26 }
 0x9b0   :  { %v950_v32 = vpop.f32.mrb[20].mxu0 }
 0x9b1   :  { %v951_v33 = vadd.f32 %v1095_v31, %v950_v32  ;;  %v1205_v34 = vpop.f32.mrb[21].mxu0 }
 0x9b2   :  { %v953_v35 = vpop.f32.mrb[22].mxu0 }
 0x9b3   :  { %v959_v36 = vmul.f32 0.70710677, %v951_v33  ;;  %v954_v37 = vadd.f32 %v1095_v31, %v953_v35  ;;  %v1206_v38 = vpop.f32.mrb[23].mxu0  ;;  %v957_v43 = vmul.f32 0.5, %v951_v33 }
 0x9b5   :  { %1315 = verf.f32 %v959_v36  ;;  %v960_v39 = vmul.f32 0.70710677, %v954_v37  ;;  %v958_v44 = vmul.f32 0.5, %v954_v37 }
 0x9b7   :  { %1317 = verf.f32 %v960_v39 }
 0x9bf   :  { %v1316_v15 = vpop.eup %1315 }
 0x9c0   :  { %v963_v40 = vadd.f32 1.0, %v1316_v15 }
 0x9c1   :  { %v1318_v41 = vpop.eup %1317 }
 0x9c2   :  { %v964_v45 = vadd.f32 1.0, %v1318_v41  ;;  %v965_v46 = vmul.f32 %v963_v40, %v957_v43 }
 0x9c4   :  { %v966_v47 = vmul.f32 %v964_v45, %v958_v44 }
 0x9c6   :  { %v967_v48 = vpack.c.bf16 %v966_v47, %v965_v46 }
 0x9c8   :  { %1216 = vmatmul.mubr.msk.bf16.vlgmr.msra.gmra.mrb[20].mxu1 %vm1007_vm7, %v967_v48 }
 0xa9b   :  { %v1045_v52 = vpop.f32.mrb[20].mxu1 }
 0xa9c   :  { %v1046_v49 = vadd.f32 %v1099_v51, %v1045_v52  ;;  %v1217_v54 = vpop.f32.mrb[21].mxu1 }
 0xa9d   :  { %v1048_v53 = vpop.f32.mrb[22].mxu1 }
 0xa9e   :  { %v1052_v50 = vadd.f32 %v1046_v49, %v1705_v56  ;;  %v1049_v55 = vadd.f32 %v1099_v51, %v1048_v53  ;;  %v1218_v57 = vpop.f32.mrb[23].mxu1 }
 0xaa0   :  { %1054 = vst.msk [vmem:[#allocation10] sm:$0xff] %vm97_vm0, %v1052_v50  ;;  %v1053_v58 = vadd.f32 %v1049_v55, %v1708_v59 }
 0xaa2   :  { %1055 = vst.msk [vmem:[#allocation10 + $0x8] sm:$0xff] %vm97_vm0, %v1053_v58 }
 0xaa3   :  { %1418 = shalt.err (!%p1415_p8)
}
 0xaa4   :  { %s1419_s16 = scalar_lea.hbm %s1777_s13, 256 }
 0xaa5   :  { %p1420_p9 = scmp.ne.s32.totalorder %s1777_s13, %s1419_s16  ;;  %p1423_p10 = scmp.lt.u32.totalorder %s1419_s16, %s1777_s13 }
 0xaa7   :  { %p1425_p11 = pnand %p1423_p10, %p1420_p9 }
 0xaa9   :  { %1428 = shalt.err (!%p1425_p11)
}
 0xaaa   :  { %s1452_s21 = smov 128  }
 0xaab   :  { %1067 = dma.vmem_to_hbm [thread:$0]  %s1062_s1, 256, %s1777_s13, [#allocation4], %s1452_s21, %s1452_s21, %s1448_s22  }
 0xaac   :  { %1435 = dma.done.wait [#allocation4], 256  }
 0xaad   :  { %1436 = vsyncadd [#allocation4], 4294967040 }
 0xaae   :  { %1071 = vsyncpa [#allocation3], 1 }
 0xaaf   :  { %1072 = vsyncpa [#allocation6], 1 }
 0xab0   :  { %1073 = vsyncpa [#allocation9], 1 }
 0xab1   :  { %1074 = vsyncpa [#allocation4], 1 }

</bundles_post_ra>
